<compile_context>
chip_gen: v7x
topology: tpu7x:2x2x1
jax: 0.10.0
libtpu: 0.0.40
codegen_flags: <defaults>
</compile_context>

<pallas_src>
import math

import jax
import jax.numpy as jnp
from jax.experimental import pallas as pl
from jax.experimental.pallas import tpu as pltpu


def _make_positional_encoding(d_model: int, max_seq_length: int,
                              dtype=jnp.float32) -> jnp.ndarray:
    """Sinusoidal PE table, returned flat as (1, max_seq_length * d_model)."""
    position = jnp.arange(max_seq_length, dtype=jnp.float32)[:, None]           # (L, 1)
    div_term = jnp.exp(
        jnp.arange(0, d_model, 2, dtype=jnp.float32) * -(math.log(10000.0) / d_model)
    )                                                                            # (D/2,)
    angles = position * div_term                                                 # (L, D/2)
    pe = jnp.zeros((max_seq_length, d_model), dtype=jnp.float32)
    pe = pe.at[:, 0::2].set(jnp.sin(angles))
    pe = pe.at[:, 1::2].set(jnp.cos(angles))
    # Pre-cast once at module setup and flatten: the first S rows are
    # contiguous, so pe[:, :S, :] is exactly the first S*D elements of this
    # flat view -- the kernel grid does the slice implicitly.
    return pe.astype(dtype).reshape(1, max_seq_length * d_model)                 # (1, L*D)


_TARGET_BLOCK_BYTES = 4 << 20   # ~4 MiB x block: amortizes ~0.35 us/step overhead
_MIN_GRID_STEPS = 8             # keep work for v7x's 2 TCs + pipelining


def _cdiv(a: int, b: int) -> int:
    return -(-a // b)


def _choose_tiles(B: int, F: int, itemsize: int) -> tuple[int, int]:
    """Pick (tile_b, tile_f) for the flattened (B, F) layout."""
    # Sublane tile scaled by dtype packing: 8 (f32) / 16 (bf16) / 32 (int8/fp8).
    native_sub = 8 * max(1, 4 // itemsize)
    tile_b = native_sub if (B % native_sub == 0) else B   # full dim is always legal
    steps_b = _cdiv(B, tile_b)

    # Feature tile: multiple of 128 lanes, ~_TARGET_BLOCK_BYTES per x block,
    # capped so the total grid keeps >= _MIN_GRID_STEPS steps when possible.
    f_units = _cdiv(F, 128)
    target_units = max(1, _TARGET_BLOCK_BYTES // (tile_b * itemsize * 128))
    need_f_steps = max(1, _cdiv(_MIN_GRID_STEPS, steps_b))
    cap_units = max(1, f_units // need_f_steps)
    tile_units = max(1, min(target_units, cap_units, f_units))
    tile_f = tile_units * 128
    if tile_f >= F:
        tile_f = F   # single full-width block: always a legal block shape
    return tile_b, tile_f


def _add_pe_kernel(x_ref, pe_ref, o_ref):
    # x_ref: (tile_b, tile_f); pe_ref: (1, tile_f) broadcasts over the batch
    # sublanes. Pure VPU add; the kernel is HBM-streaming bound.
    o_ref[...] = (x_ref[...] + pe_ref[...]).astype(o_ref.dtype)


def positional_encoding_forward(x: jnp.ndarray, pe_flat: jnp.ndarray,
                                *, donate_x: bool = False) -> jnp.ndarray:
    """x: (B, S, D); pe_flat: (1, L*D) with L*D >= S*D.  Returns x + pe[:, :S]."""
    B, S, D = x.shape
    F = S * D
    assert pe_flat.ndim == 2 and pe_flat.shape[0] == 1 and pe_flat.shape[1] >= F

    if pe_flat.dtype != x.dtype:
        # NOTE: the add is done in x.dtype (PyTorch adds the f32 buffer then
        # keeps x.dtype); for sub-f32 activations differences are ULP-level.
        pe_flat = pe_flat.astype(x.dtype)

    x_flat = x.reshape(B, F)                                  # lane-dense 2D view
    itemsize = jnp.dtype(x.dtype).itemsize
    tile_b, tile_f = _choose_tiles(B, F, itemsize)
    grid = (_cdiv(F, tile_f), _cdiv(B, tile_b))               # batch innermost

    out_flat = pl.pallas_call(
        _add_pe_kernel,
        out_shape=jax.ShapeDtypeStruct((B, F), x.dtype),
        grid_spec=pltpu.PrefetchScalarGridSpec(
            num_scalar_prefetch=0,
            grid=grid,
            in_specs=[
                # x tile: depends on both grid axes; ragged last blocks masked.
                pl.BlockSpec((tile_b, tile_f), lambda f, b: (b, f)),
                # PE tile: depends only on the F tile -> stays VMEM-resident
                # across the inner batch loop (one HBM fetch per F tile).
                pl.BlockSpec((1, tile_f), lambda f, b: (0, f)),
            ],
            out_specs=pl.BlockSpec((tile_b, tile_f), lambda f, b: (b, f)),
        ),
        compiler_params=pltpu.CompilerParams(
            dimension_semantics=("parallel", "parallel"),
            vmem_limit_bytes=48 << 20,   # actual use ~17 MiB; < 64 MiB v7x VMEM
        ),
        # Only alias x to the output when the caller actually donates x;
        # otherwise XLA inserts a defensive copy (an extra HBM sweep).
        input_output_aliases=({0: 0} if donate_x else {}),
    )(x_flat, pe_flat)

    return out_flat.reshape(B, S, D)


# TODO(synk): the remaining meaningful win is fusing this add into the
# producer (embedding/input projection) or consumer (first QKV matmul) so the
# extra read+write sweep of x over HBM disappears entirely.


if __name__ == "__main__":
    # Module config (deterministic, in-script -- no checkpoint loading).
    d_model = 32
    max_seq_length = 16

    # Small example input consistent with forward(x): (batch, seq, d_model).
    batch, seq = 2, 8
    key = jax.random.PRNGKey(0)
    x = jax.random.normal(key, (batch, seq, d_model), dtype=jnp.float32)

    # "Module setup": build + pre-cast + pre-flatten the PE buffer once.
    pe_flat = _make_positional_encoding(d_model, max_seq_length, dtype=x.dtype)

    out = positional_encoding_forward(x, pe_flat)
    out = jax.block_until_ready(out)

    # Correctness check against the plain-JAX reference of the PyTorch forward.
    pe_3d = pe_flat.reshape(1, max_seq_length, d_model)
    ref = x + pe_3d[:, :seq]
    assert out.shape == (batch, seq, d_model)
    assert jnp.allclose(out, ref, atol=1e-6), "mismatch vs reference"

    print("KERNEL_OK")
</pallas_src>

<mosaic_0001>
module attributes {stable_mosaic.version = 11 : i64} {
  func.func @_add_pe_kernel(%arg0: i32, %arg1: i32, %arg2: memref<2x128xf32, #tpu.memory_space<vmem>>, %arg3: memref<1x128xf32, #tpu.memory_space<vmem>>, %arg4: memref<2x128xf32, #tpu.memory_space<vmem>>) attributes {dimension_semantics = [#tpu.dimension_semantics<parallel>, #tpu.dimension_semantics<parallel>], iteration_bounds = array<i64: 2, 1>, scalar_prefetch = 0 : i64, scratch_operands = 0 : i64, tpu.core_type = #tpu.core_type<tc>, window_params = [{transform_indices = @transform_0, window_bounds = array<i64: 2, 128>}, {transform_indices = @transform_1, window_bounds = array<i64: 1, 128>}, {transform_indices = @transform_2, window_bounds = array<i64: 2, 128>}]} {
    %c0 = arith.constant 0 : index
    %c0_0 = arith.constant 0 : index
    %0 = vector.load %arg2[%c0, %c0_0] : memref<2x128xf32, #tpu.memory_space<vmem>>, vector<2x128xf32>
    %c0_1 = arith.constant 0 : index
    %c0_2 = arith.constant 0 : index
    %1 = vector.load %arg3[%c0_1, %c0_2] : memref<1x128xf32, #tpu.memory_space<vmem>>, vector<1x128xf32>
    %2 = vector.broadcast %1 : vector<1x128xf32> to vector<2x128xf32>
    %3 = arith.addf %0, %2 : vector<2x128xf32>
    %c0_3 = arith.constant 0 : index
    %c0_4 = arith.constant 0 : index
    %4 = vector.load %arg4[%c0_3, %c0_4] : memref<2x128xf32, #tpu.memory_space<vmem>>, vector<2x128xf32>
    tpu.vector_store %arg4[%c0_3, %c0_4], %3 {strides = array<i32>} : memref<2x128xf32, #tpu.memory_space<vmem>>, vector<2x128xf32>,
    return
  }
  func.func @transform_0(%arg0: i32, %arg1: i32) -> (i32, i32) {
    %c0_i32 = arith.constant 0 : i32
    return %arg1, %arg0 : i32, i32
  }
  func.func @transform_1(%arg0: i32, %arg1: i32) -> (i32, i32) {
    %c0_i32 = arith.constant 0 : i32
    %c0_i32_0 = arith.constant 0 : i32
    return %c0_i32, %arg0 : i32, i32
  }
  func.func @transform_2(%arg0: i32, %arg1: i32) -> (i32, i32) {
    %c0_i32 = arith.constant 0 : i32
    return %arg1, %arg0 : i32, i32
  }
}

</mosaic_0001>

<bundles_post_ra>
// kernel: tpu_custom_call.1
= control target key start
LH: loop header
LB: loop body
LE: loop exit
PB: predicated region body
PF: predicated region fallthrough
CT: control target
= control target key end

     0   :  { %7 = vsyncpa [#allocation3], 0  ;;  %s802_s0 = inlined_call_operand.hbm [shape: f32[2,256], index: 0, kind: input, shape index: {}]   ;;  %s803_s1 = inlined_call_operand.hbm [shape: f32[1,512], index: 1, kind: input, shape index: {}]   ;;  %s804_s2 = inlined_call_operand.hbm [shape: f32[2,256], index: 2, kind: output, shape index: {}]  }
   0x1   :  { %9 = vsyncpa [#allocation3 + $0x1], 0 }
   0x2   :  { %10 = vsyncpa [#allocation6], 0 }
   0x3   :  { %12 = vsyncpa [#allocation6 + $0x1], 0 }
   0x4   :  { %13 = vsyncpa [#allocation4], 0 }
   0x5   :  { %15 = vsyncpa [#allocation4 + $0x1], 0  ;;  %s587_s9 = smov 0   ;;  %s589_s10 = smov 0  }
   0x6   :  { %s591_s11 = smov 0   ;;  %s593_s12 = smov 0  }
   0x7   :  { %s595_s13 = smov 0   ;;  %s597_s14 = smov 0  }
   0x8 LB: > { %s339_s15 = sadd.s32 4294967295, %s567_s14   ;;  %s340_s16 = sadd.s32 4294967294, %s567_s14   ;;  %s567_s14 = sphi %s597_s14, %s21_s14   ;;  %s563_s13 = sphi %s595_s13, %s824_s13   ;;  %s559_s12 = sphi %s593_s12, %s823_s12   ;;  %s555_s11 = sphi %s591_s11, %s822_s11   ;;  %s551_s10 = sphi %s589_s10, %s821_s10   ;;  %s547_s9 = sphi %s587_s9, %s820_s9  }
   0x9   : > { %s33_s17 = sadd.s32 1, %s563_s13  ;;  %s42_s18 = sadd.s32 1, %s555_s11 }
   0xa   : > { %p35_p0 = scmp.ge.s32.totalorder %s33_s17, 2  ;;  %p49_p1 = scmp.ne.s32.totalorder %s555_s11, %s551_s10 }
   0xb   : > { %p50_p2 = scmp.eq.s32.totalorder %s567_s14, 0  ;;  %p55_p3 = scmp.ne.s32.totalorder %s551_s10, %s547_s9 }
   0xc   : > { %s826_s17 = smov (%p35_p0, %s33_s17), 0  ;;  %p56_p5 = scmp.eq.s32.totalorder %s339_s15, 0 }
   0xd   : > { %p628_p4 = por %p50_p2, %p49_p1  ;;  %s38_s20 = ssub.s32 %s563_s13, %s826_s17 }
   0xe   : > { %p107_p6 = scmp.eq.s32.totalorder %s339_s15, 1  ;;  %p40_p7 = scmp.eq.s32.totalorder %s38_s20, 0 }
   0xf   : > { %p634_p8 = por %p56_p5, %p55_p3  ;;  %p113_p10 = scmp.eq.s32.totalorder %s340_s16, 1 }
  0x10   : > { %p638_p9 = por %p107_p6, %p49_p1  ;;  %p371_p13 = scmp.lt.s32.totalorder %s567_s14, 2 }
  0x11   : > { %s808_s21 = scalar_select %p634_p8, 1, 0 }
  0x12   : > { %s809_s22 = scalar_select %p638_p9, 1, 0 }
  0x13   : > { %s643_s23 = scalar_select %p40_p7, %s555_s11, %s42_s18  }
  0x14   : > { %p645_p11 = por %p113_p10, %p55_p3  ;;  %s652_s25 = sand.u32 1, %s555_s11  }
  0x15   : > { %s343_s26 = sshll.u32 %s652_s25, 1  ;;  %s344_s27 = sshll.u32 %s563_s13, 5 }
  0x16   : > { %s810_s24 = scalar_select %p645_p11, 1, 0 }
  0x17   : > { %s659_s30 = scalar_lea.hbm %s802_s0, %s344_s27  ;;  %s137_s3 = scalar_lea.vmem [#allocation2], %s343_s26 }
  0x18   : > { %s146_s4 = sshll.u32 %s137_s3, 4  ;;  %p665_p0 = pnand %p371_p13, %p628_p4  ;;  %s661_s4 = int_to_ptr.vmem [resolvable:$true] %s146_s4 }
  0x19   : > { %s134_s6 = scalar_lea.sflag [#allocation3], %s652_s25  ;;  %s421_s7 = scalar_lea.hbm %s659_s30, 32 }
  0x1a   : > { %p422_p3 = scmp.ne.s32.totalorder %s659_s30, %s421_s7  ;;  %p423_p5 = pneg %p665_p0 }
  0x1b   : > { %s426_s16 = scalar_lea.hbm %s802_s0, 64  ;;  %p427_p4 = scmp.lt.u32.totalorder %s659_s30, %s802_s0 }
  0x1c   : > { %p424_p6 = pnand %p423_p5, %p422_p3  ;;  %p428_p10 = scmp.lt.u32.totalorder %s426_s16, %s421_s7 }
  0x1d   : > { %p430_p12 = scmp.lt.u32.totalorder %s421_s7, %s659_s30 }
  0x1e   : > { %p425_p7 = pneg %p424_p6  ;;  %p429_p13 = por %p428_p10, %p427_p4 }
  0x20   : > { %p431_p1 = por %p430_p12, %p429_p13 }
  0x22   : > { %p432_p2 = pnand %p431_p1, %p425_p7 }
  0x24   : > { %435 = shalt.err (!%p432_p2)
}
  0x25   : > { %s436_s20 = scalar_lea.vmem %s661_s4, 32  ;;  %s569_s26 = smov [#allocation2]  }
  0x26   : > { %p437_p3 = scmp.ne.s32.totalorder %s661_s4, %s436_s20  ;;  %s441_s27 = sshll.u32 %s569_s26, 4  ;;  %s442_s27 = int_to_ptr.vmem [resolvable:$false] %s441_s27 }
  0x27   : > { %s443_s28 = scalar_lea.vmem %s442_s27, 64  ;;  %p444_p9 = scmp.lt.s32.totalorder %s661_s4, %s442_s27 }
  0x28   : > { %p439_p6 = pnand %p437_p3, %p423_p5  ;;  %p445_p4 = scmp.lt.s32.totalorder %s443_s28, %s436_s20 }
  0x2a   : > { %p440_p11 = pneg %p439_p6  ;;  %p446_p10 = por %p445_p4, %p444_p9 }
  0x2c   : > { %p447_p12 = pnand %p446_p10, %p440_p11 }
  0x2e   : > { %450 = shalt.err (!%p447_p12)
}
  0x2f   : > { %363 = dma.hbm_to_vmem [thread:$0]  (!%p665_p0), %s659_s30, 32, %s661_s4, %s134_s6  }
  0x30   : > { %p812_p1 = scmp.lt.s32.totalorder %s567_s14, 3  ;;  %p813_p2 = scmp.ge.s32.totalorder %s567_s14, 1 }
  0x31   : > { %s345_s3 = sshll.u32 %s563_s13, 4  ;;  %s156_s7 = scalar_lea.vmem [#allocation5], %s652_s25 }
  0x32   : > { %p701_p7 = pnand %p813_p2, %p812_p1  ;;  %s163_s8 = sshll.u32 %s156_s7, 4  ;;  %s164_s8 = int_to_ptr.vmem [resolvable:$true] %s163_s8 }
  0x33   : > { %s710_s18 = scalar_lea.hbm %s803_s1, %s345_s3  ;;  %s154_s30 = scalar_lea.sflag [#allocation6], %s652_s25 }
  0x34   : > { %s814_s29 = scalar_select %p701_p7, 1, 0 }
  0x35   : > { %s451_s4 = scalar_lea.hbm %s710_s18, 16  ;;  %s456_s20 = scalar_lea.hbm %s803_s1, 64 }
  0x36   : > { %p452_p9 = scmp.ne.s32.totalorder %s710_s18, %s451_s4  ;;  %p457_p3 = scmp.lt.u32.totalorder %s710_s18, %s803_s1 }
  0x37   : > { %p458_p6 = scmp.lt.u32.totalorder %s456_s20, %s451_s4  ;;  %p460_p10 = scmp.lt.u32.totalorder %s451_s4, %s710_s18 }
  0x38   : > { %p454_p11 = pnand %p452_p9, %p423_p5 }
  0x39   : > { %p459_p4 = por %p458_p6, %p457_p3 }
  0x3a   : > { %p455_p13 = pneg %p454_p11 }
  0x3b   : > { %p461_p12 = por %p460_p10, %p459_p4 }
  0x3d   : > { %p462_p1 = pnand %p461_p12, %p455_p13 }
  0x3f   : > { %465 = shalt.err (!%p462_p1)
}
  0x40   : > { %s466_s25 = scalar_lea.vmem %s164_s8, 16  ;;  %s570_s28 = smov [#allocation5]  }
  0x41   : > { %p467_p2 = scmp.ne.s32.totalorder %s164_s8, %s466_s25  ;;  %s471_s3 = sshll.u32 %s570_s28, 4  ;;  %s472_s3 = int_to_ptr.vmem [resolvable:$false] %s471_s3 }
  0x42   : > { %s473_s7 = scalar_lea.vmem %s472_s3, 32  ;;  %p474_p8 = scmp.lt.s32.totalorder %s164_s8, %s472_s3 }
  0x43   : > { %p469_p9 = pnand %p467_p2, %p423_p5  ;;  %p475_p7 = scmp.lt.s32.totalorder %s473_s7, %s466_s25 }
  0x45   : > { %p470_p11 = pneg %p469_p9  ;;  %p476_p3 = por %p475_p7, %p474_p8 }
  0x47   : > { %p477_p6 = pnand %p476_p3, %p470_p11 }
  0x49   : > { %480 = shalt.err (!%p477_p6)
}
  0x4a   : > { %366 = dma.hbm_to_vmem [thread:$0]  (!%p665_p0), %s710_s18, 16, %s164_s8, %s154_s30  }
  0x4b   : > { %p815_p13 = scmp.ne.s32.totalorder %s814_s29, 0 }
  0x4c   : > { %s735_s15 = sand.u32 (!%p815_p13), 1, %s551_s10   ;;  %p816_p5 = scmp.ne.s32.totalorder (!%p815_p13), %s808_s21, 0 }
  0x4d   : > { %172 = sbr.rel (%p815_p13) target bundleno = 113 (0x71), region = 28  ;;  %s347_s16 = sshll.u32 (!%p815_p13), %s735_s15, 1 }
  0x4e   : > { %s175_s4 = scalar_lea.sflag (!%p815_p13), [#allocation3], %s735_s15  ;;  %s178_s6 = scalar_lea.vmem (!%p815_p13), [#allocation2], %s347_s16 }
  0x54   : > { %534 = dma.done.wait (%p816_p5), %s175_s4, 32  }
  0x55   : > { %536 = vsyncadd (%p816_p5), %s175_s4, 4294967264  ;;  %s184_s5 = scalar_lea.sflag [#allocation6], %s735_s15  ;;  %s186_s29 = scalar_lea.vmem [#allocation5], %s735_s15 }
  0x56   : > { %538 = dma.done.wait (%p816_p5), %s184_s5, 16  }
  0x57   : > { %540 = vsyncadd (%p816_p5), %s184_s5, 4294967280  ;;  %s210_s8 = scalar_lea.vmem [#allocation7], %s347_s16  ;;  %s351_s30 = sshll.u32 %s559_s12, 5  ;;  %v211_v0 = vld [vmem:[%s178_s6] sm:$0x3] }
  0x58   : > { %s237_s18 = sshll.u32 %s210_s8, 4  ;;  %v349_v1 = vld [vmem:[%s186_s29] ss:$0 sm:$0xff]  ;;  %s755_s26 = scalar_lea.hbm %s804_s2, %s351_s30  ;;  %s750_s18 = int_to_ptr.vmem [resolvable:$true] %s237_s18 }
  0x59   : > { %v219_v2 = vadd.f32 %v349_v1, %v211_v0  ;;  %s222_s21 = scalar_lea.sflag [#allocation4], %s735_s15  ;;  %s481_s27 = scalar_lea.vmem %s750_s18, 32 }
  0x5a   : > { %p482_p8 = scmp.ne.s32.totalorder %s750_s18, %s481_s27  ;;  %p817_p0 = scmp.ne.s32.totalorder %s809_s22, 0 }
  0x5b   : > { %220 = vst [vmem:[%s210_s8] sm:$0x3] %v219_v2  ;;  %s571_s12 = smov [#allocation7]  }
  0x5c   : > { %p483_p7 = pnand %p482_p8, %p817_p0  ;;  %s485_s25 = sshll.u32 %s571_s12, 4  ;;  %s486_s25 = int_to_ptr.vmem [resolvable:$false] %s485_s25 }
  0x5d   : > { %s487_s28 = scalar_lea.vmem %s486_s25, 64  ;;  %p488_p10 = scmp.lt.s32.totalorder %s750_s18, %s486_s25 }
  0x5e   : > { %p484_p4 = pneg %p483_p7  ;;  %p489_p12 = scmp.lt.s32.totalorder %s487_s28, %s481_s27 }
  0x60   : > { %p490_p1 = por %p489_p12, %p488_p10 }
  0x62   : > { %p491_p2 = pnand %p490_p1, %p484_p4 }
  0x64   : > { %494 = shalt.err (!%p491_p2)
}
  0x65   : > { %s495_s3 = scalar_lea.hbm %s755_s26, 32  ;;  %s499_s16 = scalar_lea.hbm %s804_s2, 64 }
  0x66   : > { %p496_p9 = scmp.ne.s32.totalorder %s755_s26, %s495_s3  ;;  %p500_p6 = scmp.lt.u32.totalorder %s755_s26, %s804_s2 }
  0x67   : > { %p501_p13 = scmp.lt.u32.totalorder %s499_s16, %s495_s3  ;;  %p503_p8 = scmp.lt.u32.totalorder %s495_s3, %s755_s26 }
  0x68   : > { %p497_p11 = pnand %p496_p9, %p817_p0 }
  0x69   : > { %p502_p5 = por %p501_p13, %p500_p6 }
  0x6a   : > { %p498_p3 = pneg %p497_p11 }
  0x6b   : > { %p504_p7 = por %p503_p8, %p502_p5 }
  0x6d   : > { %p505_p4 = pnand %p504_p7, %p498_p3 }
  0x6f   : > { %508 = shalt.err (!%p505_p4)
}
  0x70   : > { %358 = dma.vmem_to_hbm [thread:$0]  (%p817_p0), %s750_s18, 32, %s755_s26, %s222_s21  }
  0x71 PF: > { %s249_s5 = sand.u32 1, %s547_s9   ;;  %p818_p10 = scmp.ne.s32.totalorder %s810_s24, 0 }
  0x72   : > { %p819_p12 = scmp.ge.s32.totalorder %s567_s14, 2  ;;  %s250_s29 = scalar_lea.sflag [#allocation4], %s249_s5 }
  0x74   : > { %p368_p1 = pnand %p819_p12, %p818_p10 }
  0x76   : > { %542 = dma.done.wait (!%p368_p1), %s250_s29, 32  }
  0x77   : > { %544 = vsyncadd (!%p368_p1), %s250_s29, 4294967264  ;;  %s21_s14 = sadd.s32 1, %s567_s14   ;;  %s820_s9 = smov %s551_s10 }
  0x78   : > { %p18_p2 = scmp.ge.s32.totalorder %s21_s14, 4   ;;  %s821_s10 = smov %s555_s11 }
  0x79   : > { %s822_s11 = smov %s643_s23  ;;  %s823_s12 = smov %s563_s13 }
  0x7a   : > { %s824_s13 = smov %s826_s17  ;;  %20 = sbr.rel (!%p18_p2) target bundleno = 8 (0x8), region = 86 }
  0x81   :  { %255 = vsyncpa [#allocation3], 1 }
  0x82   :  { %257 = vsyncpa [#allocation3 + $0x1], 1 }
  0x83   :  { %258 = vsyncpa [#allocation6], 1 }
  0x84   :  { %260 = vsyncpa [#allocation6 + $0x1], 1 }
  0x85   :  { %261 = vsyncpa [#allocation4], 1 }
  0x86   :  { %263 = vsyncpa [#allocation4 + $0x1], 1 }

</bundles_post_ra>
